<compile_context>
chip_gen: v7x
topology: tpu7x:2x2x1
jax: 0.10.0
libtpu: 0.0.40
codegen_flags: <defaults>
</compile_context>

<pallas_src>
import jax
import jax.numpy as jnp
from jax.experimental import pallas as pl
from jax.experimental.pallas import tpu as pltpu

_LANE = 128
_SUBLANE = 8


def _round_up(n, m):
    return ((n + m - 1) // m) * m


def _mlp_kernel(x_ref,
                w1_ref, b1_ref,
                w2_ref, b2_ref,
                w3_ref, b3_ref,
                w4_ref, b4_ref,
                probas_ref, logits_ref):
    # x may be f32 or bf16; MXU accumulates in f32 via preferred_element_type,
    # all biases/activations are f32 (matches torch x.float() semantics in the
    # default-precision path).
    x = x_ref[...]

    h = jnp.dot(x, w1_ref[...], preferred_element_type=jnp.float32) + b1_ref[...]
    h = jnp.maximum(h, 0.0)

    h = jnp.dot(h, w2_ref[...], preferred_element_type=jnp.float32) + b2_ref[...]
    h = jnp.maximum(h, 0.0)

    h = jnp.dot(h, w3_ref[...], preferred_element_type=jnp.float32) + b3_ref[...]
    h = jnp.maximum(h, 0.0)

    # Final matmul is computed at the 128-lane-padded class width (lane-dense
    # MXU tile); only the first C lanes are real classes.  The stores are
    # narrow (tb, C) -> HBM writeback is only C columns wide.
    logits_full = (jnp.dot(h, w4_ref[...], preferred_element_type=jnp.float32)
                   + b4_ref[...])
    c = logits_ref.shape[-1]
    logits = logits_full[:, :c]
    logits_ref[...] = logits
    probas_ref[...] = jax.nn.sigmoid(logits)


def mlp_forward(x, params, *, batch_tile=4096, use_bf16_inputs=True,
                vmem_budget_bytes=16 * 1024 * 1024):
    """Full MLP in one Pallas kernel, pipelined over batch tiles.

    batch_tile: target rows per grid step (rounded to a multiple of 8).  The
    actual tile is capped by a per-tile VMEM budget (double-buffered x tile +
    double-buffered narrow f32 outputs + in-kernel f32 activations + resident
    weights) that keeps all of v5e/v6e/v7x safe, and by ceil(B/2) so v7x's two
    TensorCores both get grid steps for larger batches.

    use_bf16_inputs: default perf path — x and w1 are fed to the MXU as bf16
    (halves the dominant B*F HBM read; accumulation stays f32).  Pass False
    for bit-level parity with torch's x.float() path.  Ideally the caller
    already supplies bf16 x so the wrapper-side cast pass is skipped.
    """
    (w1, b1), (w2, b2), (w3, b3), (w4, b4) = params
    B, F = x.shape
    H = w1.shape[1]
    C = w4.shape[1]
    HP = _round_up(H, _LANE)   # hidden padded to 128 (in-kernel compute only)
    CP = _round_up(C, _LANE)   # classes padded to 128 (in-kernel compute only)

    # Zero-pad the (tiny) weights/biases once so every hidden matmul is
    # lane-dense.  Padded columns stay exactly zero through matmul+ReLU; the
    # padded logit columns are never stored.
    w1p = jnp.pad(w1, ((0, 0), (0, HP - H)))
    b1p = jnp.pad(b1, ((0, 0), (0, HP - H)))
    w2p = jnp.pad(w2, ((0, HP - H), (0, HP - H)))
    b2p = jnp.pad(b2, ((0, 0), (0, HP - H)))
    w3p = jnp.pad(w3, ((0, HP - H), (0, HP - H)))
    b3p = jnp.pad(b3, ((0, 0), (0, HP - H)))
    w4p = jnp.pad(w4, ((0, HP - H), (0, CP - C)))
    b4p = jnp.pad(b4, ((0, 0), (0, CP - C)))

    if use_bf16_inputs:
        xk = x if x.dtype == jnp.bfloat16 else x.astype(jnp.bfloat16)
        w1p = w1p.astype(jnp.bfloat16)
    else:
        xk = x if x.dtype == jnp.float32 else x.astype(jnp.float32)
    x_itemsize = jnp.dtype(xk.dtype).itemsize

    # --- tile-size selection ------------------------------------------------
    weight_elems = (w1p.size + w2p.size + w3p.size + w4p.size
                    + b1p.size + b2p.size + b3p.size + b4p.size)
    weight_bytes = 2 * 4 * weight_elems          # conservative: f32, 2 buffers

    # Per-row VMEM: double-buffered x tile, double-buffered narrow f32
    # outputs (probas + logits), plus ~4 live (tb, HP) f32 activation temps.
    bytes_per_row = (2 * F * x_itemsize
                     + 2 * 2 * C * 4
                     + 4 * HP * 4)
    avail = max(vmem_budget_bytes - weight_bytes, _SUBLANE * bytes_per_row)
    max_rows = max(_SUBLANE, (avail // bytes_per_row) // _SUBLANE * _SUBLANE)

    batch_tile = _round_up(max(int(batch_tile), _SUBLANE), _SUBLANE)
    tb = min(batch_tile, max_rows)
    # v7x has 2 TensorCores: keep >=2 grid steps once B exceeds one tile so
    # the ("parallel",) batch axis shards across both (free on v5e/v6e).
    tb = min(tb, _round_up(pl.cdiv(max(B, 1), 2), _SUBLANE))
    tb = min(tb, _round_up(max(B, 1), _SUBLANE))
    tb = max(_SUBLANE, tb)

    grid = (pl.cdiv(B, tb),)   # partial last block handled by Pallas masking

    est_vmem = weight_bytes + tb * bytes_per_row
    vmem_limit = int(min(max(32 * 1024 * 1024, 2 * est_vmem),
                         48 * 1024 * 1024))   # safe on v5e/v6e/v7x

    # --- specs ---------------------------------------------------------------
    def _const_spec(arr):
        shape = arr.shape
        # whole-array block, constant index_map -> stays VMEM-resident across
        # the batch grid (no per-step weight DMA).
        return pl.BlockSpec(shape, lambda i, _s=shape: (0,) * len(_s))

    in_specs = [
        pl.BlockSpec((tb, F), lambda i: (i, 0)),   # x tile (pipelined DMA)
        _const_spec(w1p), _const_spec(b1p),
        _const_spec(w2p), _const_spec(b2p),
        _const_spec(w3p), _const_spec(b3p),
        _const_spec(w4p), _const_spec(b4p),
    ]
    out_specs = [
        pl.BlockSpec((tb, C), lambda i: (i, 0)),   # probas (true width C)
        pl.BlockSpec((tb, C), lambda i: (i, 0)),   # logits (true width C)
    ]

    param_bytes = 4 * (weight_elems - w1p.size) + w1p.size * x_itemsize
    cost = pl.CostEstimate(
        flops=2 * B * (F * HP + 2 * HP * HP + HP * CP),
        transcendentals=B * C,                           # sigmoid
        bytes_accessed=B * F * x_itemsize + param_bytes + 2 * B * C * 4,
    )

    probas, logits = pl.pallas_call(
        _mlp_kernel,
        out_shape=(
            jax.ShapeDtypeStruct((B, C), jnp.float32),
            jax.ShapeDtypeStruct((B, C), jnp.float32),
        ),
        grid_spec=pltpu.PrefetchScalarGridSpec(
            num_scalar_prefetch=0,
            grid=grid,
            in_specs=in_specs,
            out_specs=out_specs,
        ),
        compiler_params=pltpu.CompilerParams(
            dimension_semantics=("parallel",),
            vmem_limit_bytes=vmem_limit,
        ),
        cost_estimate=cost,
    )(xk, w1p, b1p, w2p, b2p, w3p, b3p, w4p, b4p)

    return probas, logits


def init_mlp_params(key, num_features, num_classes, hidden=50):
    """Deterministic init mimicking torch.nn.Linear default (uniform +/- 1/sqrt(fan_in)).
    Weights stored as [in, out]; biases as [1, out]."""
    dims = [(num_features, hidden), (hidden, hidden), (hidden, hidden),
            (hidden, num_classes)]
    params = []
    for (fan_in, fan_out) in dims:
        key, kw, kb = jax.random.split(key, 3)
        bound = 1.0 / jnp.sqrt(jnp.float32(fan_in))
        w = jax.random.uniform(kw, (fan_in, fan_out), jnp.float32, -bound, bound)
        b = jax.random.uniform(kb, (1, fan_out), jnp.float32, -bound, bound)
        params.append((w, b))
    return params


def mlp_ref(x, params):
    """Pure-JAX reference of the torch forward pass."""
    h = x.astype(jnp.float32)
    for i, (w, b) in enumerate(params):
        h = h @ w + b
        if i < len(params) - 1:
            h = jnp.maximum(h, 0.0)
    return jax.nn.sigmoid(h), h


if __name__ == "__main__":
    # TODO(synk): the BertWrapper spec wraps a full HuggingFace BERT encoder;
    # per the earlier review this target is the 4-layer MLP head from
    # models.py, which is what is implemented here (the transformer stack is
    # not translated).
    num_features = 32
    num_classes = 10

    key = jax.random.PRNGKey(0)
    kx, kp, kx2 = jax.random.split(key, 3)
    params = init_mlp_params(kp, num_features, num_classes)

    # f32 parity path: bit-level comparison against the pure-JAX reference.
    x = jax.random.normal(kx, (8, num_features), jnp.float32)
    probas, logits = mlp_forward(x, params, use_bf16_inputs=False)
    jax.block_until_ready((probas, logits))
    probas_ref, logits_ref = mlp_ref(x, params)
    assert probas.shape == (8, num_classes) and logits.shape == (8, num_classes)
    assert probas.dtype == jnp.float32 and logits.dtype == jnp.float32
    assert jnp.allclose(logits, logits_ref, atol=1e-5, rtol=1e-5)
    assert jnp.allclose(probas, probas_ref, atol=1e-5, rtol=1e-5)

    # Default (bf16-input) perf path on a ragged batch (13 rows, tile 8):
    # exercises the multi-step ("parallel") grid and the partial boundary
    # block with no padded copy of x.  Looser tolerance because x/w1 are
    # rounded to bf16 before the MXU.
    x2 = jax.random.normal(kx2, (13, num_features), jnp.float32)
    p2, l2 = mlp_forward(x2, params)   # use_bf16_inputs defaults to True
    jax.block_until_ready((p2, l2))
    p2_ref, l2_ref = mlp_ref(x2, params)
    assert p2.shape == (13, num_classes) and l2.shape == (13, num_classes)
    assert jnp.allclose(l2, l2_ref, atol=1e-1, rtol=5e-2)
    assert jnp.allclose(p2, p2_ref, atol=5e-2, rtol=5e-2)

    print("KERNEL_OK")
</pallas_src>

<mosaic_0001>
module attributes {stable_mosaic.version = 11 : i64} {
  func.func @_mlp_kernel(%arg0: i32, %arg1: memref<8x32xf32, #tpu.memory_space<vmem>>, %arg2: memref<32x128xf32, #tpu.memory_space<vmem>>, %arg3: memref<1x128xf32, #tpu.memory_space<vmem>>, %arg4: memref<128x128xf32, #tpu.memory_space<vmem>>, %arg5: memref<1x128xf32, #tpu.memory_space<vmem>>, %arg6: memref<128x128xf32, #tpu.memory_space<vmem>>, %arg7: memref<1x128xf32, #tpu.memory_space<vmem>>, %arg8: memref<128x128xf32, #tpu.memory_space<vmem>>, %arg9: memref<1x128xf32, #tpu.memory_space<vmem>>, %arg10: memref<8x10xf32, #tpu.memory_space<vmem>>, %arg11: memref<8x10xf32, #tpu.memory_space<vmem>>) attributes {dimension_semantics = [#tpu.dimension_semantics<parallel>], iteration_bounds = array<i64: 1>, scalar_prefetch = 0 : i64, scratch_operands = 0 : i64, tpu.core_type = #tpu.core_type<tc>, window_params = [{transform_indices = @transform_0, window_bounds = array<i64: 8, 32>}, {pipeline_mode = #tpu.pipeline_mode<synchronous>, transform_indices = @transform_1, window_bounds = array<i64: 32, 128>}, {pipeline_mode = #tpu.pipeline_mode<synchronous>, transform_indices = @transform_2, window_bounds = array<i64: 1, 128>}, {pipeline_mode = #tpu.pipeline_mode<synchronous>, transform_indices = @transform_3, window_bounds = array<i64: 128, 128>}, {pipeline_mode = #tpu.pipeline_mode<synchronous>, transform_indices = @transform_4, window_bounds = array<i64: 1, 128>}, {pipeline_mode = #tpu.pipeline_mode<synchronous>, transform_indices = @transform_5, window_bounds = array<i64: 128, 128>}, {pipeline_mode = #tpu.pipeline_mode<synchronous>, transform_indices = @transform_6, window_bounds = array<i64: 1, 128>}, {pipeline_mode = #tpu.pipeline_mode<synchronous>, transform_indices = @transform_7, window_bounds = array<i64: 128, 128>}, {pipeline_mode = #tpu.pipeline_mode<synchronous>, transform_indices = @transform_8, window_bounds = array<i64: 1, 128>}, {transform_indices = @transform_9, window_bounds = array<i64: 8, 10>}, {transform_indices = @transform_10, window_bounds = array<i64: 8, 10>}]} {
    %c0 = arith.constant 0 : index
    %c0_0 = arith.constant 0 : index
    %0 = vector.load %arg1[%c0, %c0_0] : memref<8x32xf32, #tpu.memory_space<vmem>>, vector<8x32xf32>
    %c0_1 = arith.constant 0 : index
    %c0_2 = arith.constant 0 : index
    %1 = vector.load %arg2[%c0_1, %c0_2] : memref<32x128xf32, #tpu.memory_space<vmem>>, vector<32x128xf32>
    %cst = arith.constant dense<0.000000e+00> : vector<8x128xf32>
    %2 = tpu.matmul %0, %1, %cst {dimension_numbers = #tpu.dot_dimension_numbers<[1], [0], [0], [1], [0, 0, 1, 1], [], []>} : vector<8x32xf32>, vector<32x128xf32>, vector<8x128xf32> -> vector<8x128xf32>
    %c0_3 = arith.constant 0 : index
    %c0_4 = arith.constant 0 : index
    %3 = vector.load %arg3[%c0_3, %c0_4] : memref<1x128xf32, #tpu.memory_space<vmem>>, vector<1x128xf32>
    %4 = vector.broadcast %3 : vector<1x128xf32> to vector<8x128xf32>
    %5 = arith.addf %2, %4 : vector<8x128xf32>
    %cst_5 = arith.constant 0.000000e+00 : f32
    %6 = vector.broadcast %cst_5 : f32 to vector<8x128xf32>
    %7 = arith.maximumf %5, %6 : vector<8x128xf32>
    %c0_6 = arith.constant 0 : index
    %c0_7 = arith.constant 0 : index
    %8 = vector.load %arg4[%c0_6, %c0_7] : memref<128x128xf32, #tpu.memory_space<vmem>>, vector<128x128xf32>
    %cst_8 = arith.constant dense<0.000000e+00> : vector<8x128xf32>
    %9 = tpu.matmul %7, %8, %cst_8 {dimension_numbers = #tpu.dot_dimension_numbers<[1], [0], [0], [1], [0, 0, 1, 1], [], []>} : vector<8x128xf32>, vector<128x128xf32>, vector<8x128xf32> -> vector<8x128xf32>
    %c0_9 = arith.constant 0 : index
    %c0_10 = arith.constant 0 : index
    %10 = vector.load %arg5[%c0_9, %c0_10] : memref<1x128xf32, #tpu.memory_space<vmem>>, vector<1x128xf32>
    %11 = vector.broadcast %10 : vector<1x128xf32> to vector<8x128xf32>
    %12 = arith.addf %9, %11 : vector<8x128xf32>
    %cst_11 = arith.constant 0.000000e+00 : f32
    %13 = vector.broadcast %cst_11 : f32 to vector<8x128xf32>
    %14 = arith.maximumf %12, %13 : vector<8x128xf32>
    %c0_12 = arith.constant 0 : index
    %c0_13 = arith.constant 0 : index
    %15 = vector.load %arg6[%c0_12, %c0_13] : memref<128x128xf32, #tpu.memory_space<vmem>>, vector<128x128xf32>
    %cst_14 = arith.constant dense<0.000000e+00> : vector<8x128xf32>
    %16 = tpu.matmul %14, %15, %cst_14 {dimension_numbers = #tpu.dot_dimension_numbers<[1], [0], [0], [1], [0, 0, 1, 1], [], []>} : vector<8x128xf32>, vector<128x128xf32>, vector<8x128xf32> -> vector<8x128xf32>
    %c0_15 = arith.constant 0 : index
    %c0_16 = arith.constant 0 : index
    %17 = vector.load %arg7[%c0_15, %c0_16] : memref<1x128xf32, #tpu.memory_space<vmem>>, vector<1x128xf32>
    %18 = vector.broadcast %17 : vector<1x128xf32> to vector<8x128xf32>
    %19 = arith.addf %16, %18 : vector<8x128xf32>
    %cst_17 = arith.constant 0.000000e+00 : f32
    %20 = vector.broadcast %cst_17 : f32 to vector<8x128xf32>
    %21 = arith.maximumf %19, %20 : vector<8x128xf32>
    %c0_18 = arith.constant 0 : index
    %c0_19 = arith.constant 0 : index
    %22 = vector.load %arg8[%c0_18, %c0_19] : memref<128x128xf32, #tpu.memory_space<vmem>>, vector<128x128xf32>
    %cst_20 = arith.constant dense<0.000000e+00> : vector<8x128xf32>
    %23 = tpu.matmul %21, %22, %cst_20 {dimension_numbers = #tpu.dot_dimension_numbers<[1], [0], [0], [1], [0, 0, 1, 1], [], []>} : vector<8x128xf32>, vector<128x128xf32>, vector<8x128xf32> -> vector<8x128xf32>
    %c0_21 = arith.constant 0 : index
    %c0_22 = arith.constant 0 : index
    %24 = vector.load %arg9[%c0_21, %c0_22] : memref<1x128xf32, #tpu.memory_space<vmem>>, vector<1x128xf32>
    %25 = vector.broadcast %24 : vector<1x128xf32> to vector<8x128xf32>
    %26 = arith.addf %23, %25 : vector<8x128xf32>
    %27 = vector.extract_strided_slice %26 {offsets = [0, 0], sizes = [8, 10], strides = [1, 1]} : vector<8x128xf32> to vector<8x10xf32>
    %c0_23 = arith.constant 0 : index
    %c0_24 = arith.constant 0 : index
    %28 = vector.load %arg11[%c0_23, %c0_24] : memref<8x10xf32, #tpu.memory_space<vmem>>, vector<8x10xf32>
    tpu.vector_store %arg11[%c0_23, %c0_24], %27 {strides = array<i32>} : memref<8x10xf32, #tpu.memory_space<vmem>>, vector<8x10xf32>,
    %29 = arith.negf %27 : vector<8x10xf32>
    %30 = math.exp %29 : vector<8x10xf32>
    %cst_25 = arith.constant 1.000000e+00 : f32
    %31 = vector.broadcast %cst_25 : f32 to vector<8x10xf32>
    %32 = arith.addf %31, %30 : vector<8x10xf32>
    %33 = arith.divf %31, %32 : vector<8x10xf32>
    %c0_26 = arith.constant 0 : index
    %c0_27 = arith.constant 0 : index
    %34 = vector.load %arg10[%c0_26, %c0_27] : memref<8x10xf32, #tpu.memory_space<vmem>>, vector<8x10xf32>
    tpu.vector_store %arg10[%c0_26, %c0_27], %33 {strides = array<i32>} : memref<8x10xf32, #tpu.memory_space<vmem>>, vector<8x10xf32>,
    return
  }
  func.func @transform_0(%arg0: i32) -> (i32, i32) {
    %c0_i32 = arith.constant 0 : i32
    %c0_i32_0 = arith.constant 0 : i32
    return %arg0, %c0_i32 : i32, i32
  }
  func.func @transform_1(%arg0: i32) -> (i32, i32) {
    %c0_i32 = arith.constant 0 : i32
    %c0_i32_0 = arith.constant 0 : i32
    %c0_i32_1 = arith.constant 0 : i32
    return %c0_i32, %c0_i32_0 : i32, i32
  }
  func.func @transform_2(%arg0: i32) -> (i32, i32) {
    %c0_i32 = arith.constant 0 : i32
    %c0_i32_0 = arith.constant 0 : i32
    %c0_i32_1 = arith.constant 0 : i32
    return %c0_i32, %c0_i32_0 : i32, i32
  }
  func.func @transform_3(%arg0: i32) -> (i32, i32) {
    %c0_i32 = arith.constant 0 : i32
    %c0_i32_0 = arith.constant 0 : i32
    %c0_i32_1 = arith.constant 0 : i32
    return %c0_i32, %c0_i32_0 : i32, i32
  }
  func.func @transform_4(%arg0: i32) -> (i32, i32) {
    %c0_i32 = arith.constant 0 : i32
    %c0_i32_0 = arith.constant 0 : i32
    %c0_i32_1 = arith.constant 0 : i32
    return %c0_i32, %c0_i32_0 : i32, i32
  }
  func.func @transform_5(%arg0: i32) -> (i32, i32) {
    %c0_i32 = arith.constant 0 : i32
    %c0_i32_0 = arith.constant 0 : i32
    %c0_i32_1 = arith.constant 0 : i32
    return %c0_i32, %c0_i32_0 : i32, i32
  }
  func.func @transform_6(%arg0: i32) -> (i32, i32) {
    %c0_i32 = arith.constant 0 : i32
    %c0_i32_0 = arith.constant 0 : i32
    %c0_i32_1 = arith.constant 0 : i32
    return %c0_i32, %c0_i32_0 : i32, i32
  }
  func.func @transform_7(%arg0: i32) -> (i32, i32) {
    %c0_i32 = arith.constant 0 : i32
    %c0_i32_0 = arith.constant 0 : i32
    %c0_i32_1 = arith.constant 0 : i32
    return %c0_i32, %c0_i32_0 : i32, i32
  }
  func.func @transform_8(%arg0: i32) -> (i32, i32) {
    %c0_i32 = arith.constant 0 : i32
    %c0_i32_0 = arith.constant 0 : i32
    %c0_i32_1 = arith.constant 0 : i32
    return %c0_i32, %c0_i32_0 : i32, i32
  }
  func.func @transform_9(%arg0: i32) -> (i32, i32) {
    %c0_i32 = arith.constant 0 : i32
    %c0_i32_0 = arith.constant 0 : i32
    return %arg0, %c0_i32 : i32, i32
  }
  func.func @transform_10(%arg0: i32) -> (i32, i32) {
    %c0_i32 = arith.constant 0 : i32
    %c0_i32_0 = arith.constant 0 : i32
    return %arg0, %c0_i32 : i32, i32
  }
}

</mosaic_0001>

<bundles_post_ra>
// kernel: tpu_custom_call.1
= control target key start
LH: loop header
LB: loop body
LE: loop exit
PB: predicated region body
PF: predicated region fallthrough
CT: control target
= control target key end

     0   :  { %16 = vsyncpa [#allocation3], 0  ;;  %s1157_s0 = inlined_call_operand.hbm [shape: f32[8,32], index: 0, kind: input, shape index: {}]   ;;  %s1158_s1 = inlined_call_operand.hbm [shape: f32[32,128], index: 1, kind: input, shape index: {}]   ;;  %s1159_s2 = inlined_call_operand.vmem [shape: f32[1,128], index: 2, kind: input, shape index: {}]   ;;  %s1160_s3 = inlined_call_operand.hbm [shape: f32[128,128], index: 3, kind: input, shape index: {}]   ;;  %s1161_s4 = inlined_call_operand.vmem [shape: f32[1,128], index: 4, kind: input, shape index: {}]   ;;  %s1162_s5 = inlined_call_operand.hbm [shape: f32[128,128], index: 5, kind: input, shape index: {}]   ;;  %s1163_s6 = inlined_call_operand.vmem [shape: f32[1,128], index: 6, kind: input, shape index: {}]   ;;  %s1164_s7 = inlined_call_operand.hbm [shape: f32[128,128], index: 7, kind: input, shape index: {}]   ;;  %s1165_s8 = inlined_call_operand.vmem [shape: f32[1,128], index: 8, kind: input, shape index: {}]   ;;  %s1166_s9 = inlined_call_operand.hbm [shape: f32[8,10], index: 9, kind: output, shape index: {0}]   ;;  %s1167_s10 = inlined_call_operand.hbm [shape: f32[8,10], index: 10, kind: output, shape index: {1}]  }
   0x1   :  { %17 = vsyncpa [#allocation6], 0 }
   0x2   :  { %18 = vsyncpa [#allocation9], 0 }
   0x3   :  { %19 = vsyncpa [#allocation4], 0 }
   0x4   :  { %20 = vsyncpa [#allocation13], 0  ;;  %s946_s13 = smov [#allocation5]   ;;  %s782_s17 = scalar_lea.hbm %s1158_s1, 512 }
   0x5   :  { %s36_s14 = sshll.u32 %s946_s13, 4  ;;  %p783_p0 = scmp.ne.s32.totalorder %s1158_s1, %s782_s17  ;;  %s37_s14 = int_to_ptr.vmem [resolvable:$true] %s36_s14 }
   0x6   :  { %p786_p1 = scmp.lt.u32.totalorder %s782_s17, %s1158_s1 }
   0x8   :  { %p788_p2 = pnand %p786_p1, %p783_p0 }
   0xa   :  { %791 = shalt.err (!%p788_p2)
}
   0xb   :  { %s792_s22 = scalar_lea.vmem %s37_s14, 512  ;;  %p797_p4 = scmp.lt.s32.totalorder %s37_s14, %s37_s14 }
   0xc   :  { %p793_p3 = scmp.ne.s32.totalorder %s37_s14, %s792_s22  ;;  %p798_p5 = scmp.lt.s32.totalorder %s792_s22, %s792_s22 }
   0xe   :  { %p799_p6 = por %p798_p5, %p797_p4 }
  0x10   :  { %p800_p7 = pnand %p799_p6, %p793_p3 }
  0x12   :  { %803 = shalt.err (!%p800_p7)
}
  0x13   :  { %s947_s23 = smov 128   ;;  %s948_s24 = smov 8  }
  0x14   :  { %42 = dma.hbm_to_vmem [thread:$0]  %s1158_s1, 512, %s37_s14, [#allocation6], %s947_s23, %s947_s23, %s948_s24  }
  0x15   :  { %s949_s27 = smov [#allocation8]   ;;  %s950_s29 = smov [#allocation2]  }
  0x16   :  { %s64_s28 = sshll.u32 %s949_s27, 4  ;;  %s27_s30 = sshll.u32 %s950_s29, 4  ;;  %s65_s28 = int_to_ptr.vmem [resolvable:$true] %s64_s28  ;;  %s28_s30 = int_to_ptr.vmem [resolvable:$true] %s27_s30 }
  0x17   :  { %s804_s13 = scalar_lea.hbm %s1162_s5, 2048 }
  0x18   :  { %p805_p8 = scmp.ne.s32.totalorder %s1162_s5, %s804_s13  ;;  %p808_p9 = scmp.lt.u32.totalorder %s804_s13, %s1162_s5 }
  0x1a   :  { %p810_p10 = pnand %p808_p9, %p805_p8 }
  0x1c   :  { %813 = shalt.err (!%p810_p10)
}
  0x1d   :  { %s814_s1 = scalar_lea.vmem %s65_s28, 2048  ;;  %p819_p12 = scmp.lt.s32.totalorder %s65_s28, %s65_s28 }
  0x1e   :  { %p815_p11 = scmp.ne.s32.totalorder %s65_s28, %s814_s1  ;;  %p820_p13 = scmp.lt.s32.totalorder %s814_s1, %s814_s1 }
  0x20   :  { %p821_p0 = por %p820_p13, %p819_p12 }
  0x22   :  { %p822_p1 = pnand %p821_p0, %p815_p11 }
  0x24   :  { %825 = shalt.err (!%p822_p1)
}
  0x25   :  { %70 = dma.hbm_to_vmem [thread:$0]  %s1162_s5, 2048, %s65_s28, [#allocation9], %s947_s23, %s947_s23, %s948_s24  }
  0x26   :  { %s826_s22 = scalar_lea.hbm %s1157_s0, 128 }
  0x27   :  { %p827_p2 = scmp.ne.s32.totalorder %s1157_s0, %s826_s22  ;;  %p830_p3 = scmp.lt.u32.totalorder %s826_s22, %s1157_s0 }
  0x29   :  { %p832_p4 = pnand %p830_p3, %p827_p2 }
  0x2b   :  { %835 = shalt.err (!%p832_p4)
}
  0x2c   :  { %s836_s11 = scalar_lea.vmem %s28_s30, 128  ;;  %p841_p6 = scmp.lt.s32.totalorder %s28_s30, %s28_s30 }
  0x2d   :  { %p837_p5 = scmp.ne.s32.totalorder %s28_s30, %s836_s11  ;;  %p842_p7 = scmp.lt.s32.totalorder %s836_s11, %s836_s11 }
  0x2f   :  { %p843_p8 = por %p842_p7, %p841_p6 }
  0x31   :  { %p844_p9 = pnand %p843_p8, %p837_p5 }
  0x33   :  { %847 = shalt.err (!%p844_p9)
}
  0x34   :  { %30 = dma.hbm_to_vmem [thread:$0]  %s1157_s0, 128, %s28_s30, [#allocation3]  }
  0x35   :  { %s951_s12 = smov [#allocation7]   ;;  %s952_s15 = smov [#allocation10]  }
  0x36   :  { %s50_s13 = sshll.u32 %s951_s12, 4  ;;  %s78_s16 = sshll.u32 %s952_s15, 4  ;;  %s51_s13 = int_to_ptr.vmem [resolvable:$true] %s50_s13  ;;  %s79_s16 = int_to_ptr.vmem [resolvable:$true] %s78_s16 }
  0x37   :  { %s848_s1 = scalar_lea.hbm %s1160_s3, 2048 }
  0x38   :  { %p849_p10 = scmp.ne.s32.totalorder %s1160_s3, %s848_s1  ;;  %p852_p11 = scmp.lt.u32.totalorder %s848_s1, %s1160_s3 }
  0x3a   :  { %p854_p12 = pnand %p852_p11, %p849_p10 }
  0x3c   :  { %857 = shalt.err (!%p854_p12)
}
  0x3d   :  { %s858_s0 = scalar_lea.vmem %s51_s13, 2048  ;;  %p863_p0 = scmp.lt.s32.totalorder %s51_s13, %s51_s13 }
  0x3e   :  { %p859_p13 = scmp.ne.s32.totalorder %s51_s13, %s858_s0  ;;  %p864_p1 = scmp.lt.s32.totalorder %s858_s0, %s858_s0 }
  0x40   :  { %p865_p2 = por %p864_p1, %p863_p0 }
  0x42   :  { %p866_p3 = pnand %p865_p2, %p859_p13 }
  0x44   :  { %869 = shalt.err (!%p866_p3)
}
  0x45   :  { %56 = dma.hbm_to_vmem [thread:$0]  %s1160_s3, 2048, %s51_s13, [#allocation6], %s947_s23, %s947_s23, %s948_s24  }
  0x46   :  { %s870_s27 = scalar_lea.hbm %s1164_s7, 2048 }
  0x47   :  { %p871_p4 = scmp.ne.s32.totalorder %s1164_s7, %s870_s27  ;;  %p874_p5 = scmp.lt.u32.totalorder %s870_s27, %s1164_s7 }
  0x49   :  { %p876_p6 = pnand %p874_p5, %p871_p4 }
  0x4b   :  { %879 = shalt.err (!%p876_p6)
}
  0x4c   :  { %s880_s12 = scalar_lea.vmem %s79_s16, 2048  ;;  %p885_p8 = scmp.lt.s32.totalorder %s79_s16, %s79_s16 }
  0x4d   :  { %p881_p7 = scmp.ne.s32.totalorder %s79_s16, %s880_s12  ;;  %p886_p9 = scmp.lt.s32.totalorder %s880_s12, %s880_s12 }
  0x4f   :  { %p887_p10 = por %p886_p9, %p885_p8 }
  0x51   :  { %p888_p11 = pnand %p887_p10, %p881_p7 }
  0x53   :  { %891 = shalt.err (!%p888_p11)
}
  0x54   :  { %84 = dma.hbm_to_vmem [thread:$0]  %s1164_s7, 2048, %s79_s16, [#allocation9], %s947_s23, %s947_s23, %s948_s24  }
  0x55   :  { %936 = dma.done.wait [#allocation3], 128  }
  0x56   :  { %937 = vsyncadd [#allocation3], 4294967168 }
  0x57   :  { %938 = dma.done.wait [#allocation6], 2560  }
  0x58   :  { %939 = vsyncadd [#allocation6], 4294964736 }
  0x59   :  { %940 = dma.done.wait [#allocation9], 4096  }
  0x5a   :  { %941 = vsyncadd [#allocation9], 4294963200  ;;  %v953_v0 = vmov 0.0|0.0   ;;  %vm954_vm0 = vmmov 0   ;;  %v955_v1 = vmov 0.0   ;;  %v103_v2 = vld [vmem:[#allocation5] sm:$0xff] }
  0x5b   :  { %688 = vmatprep.subr.bf16.mxu0 %v953_v0  ;;  %580 = vmatprep.mubr.msk.f32.mxu0 %vm954_vm0, %v955_v1  ;;  %v104_v3 = vld [vmem:[#allocation5 + $0x8] sm:$0xff]  ;;  %v105_v4 = vld [vmem:[#allocation5 + $0x10] sm:$0xff]  ;;  %v106_v6 = vld [vmem:[#allocation5 + $0x18] sm:$0xff]  ;;  %vm114_vm1 = vcmask 261120   ;;  %s956_s18 = smov [#allocation12]   ;;  %vm470_vm2 = vcmask 80896  }
  0x5c   :  { %694 = vmatprep.subr.bf16.mxu1 %v953_v0  ;;  %615 = vmatprep.mubr.msk.f32.mxu1 %vm954_vm0, %v955_v1  ;;  %v689_v5 = vpack.c.bf16 %v104_v3, %v103_v2  ;;  %v189_v7 = vld [vmem:[#allocation7] sm:$0xff]  ;;  %v190_v8 = vld [vmem:[#allocation7 + $0x8] sm:$0xff]  ;;  %v191_v9 = vld [vmem:[#allocation7 + $0x10] sm:$0xff]  ;;  %v692_v11 = vpack.c.bf16 %v106_v6, %v105_v4  ;;  %s495_s1 = sshll.u32 %s956_s18, 4  ;;  %s496_s1 = int_to_ptr.vmem [resolvable:$true] %s495_s1 }
  0x5d   :  { %v192_v10 = vld [vmem:[#allocation7 + $0x18] sm:$0xff]  ;;  %v695_v12 = vpack.c.bf16 %v190_v8, %v189_v7  ;;  %v193_v14 = vld [vmem:[#allocation7 + $0x20] sm:$0xff]  ;;  %v194_v15 = vld [vmem:[#allocation7 + $0x28] sm:$0xff]  ;;  %p897_p13 = scmp.lt.s32.totalorder %s496_s1, %s496_s1 }
  0x5e   :  { %690 = vmatpush3.bf16.msra.mxu0 %v689_v5  ;;  %v698_v13 = vpack.c.bf16 %v192_v10, %v191_v9  ;;  %v102_v16 = vld [vmem:[#allocation2] sm:$0xff]  ;;  %v701_v17 = vpack.c.bf16 %v194_v15, %v193_v14  ;;  %v195_v18 = vld [vmem:[#allocation7 + $0x30] sm:$0xff]  ;;  %v197_v21 = vld [vmem:[#allocation7 + $0x40] sm:$0xff] }
  0x5f   :  { %691 = vmatprep.subr.bf16.mxu0 %v953_v0  ;;  %696 = vmatpush3.bf16.msra.mxu1 %v695_v12  ;;  %v196_v19 = vld [vmem:[#allocation7 + $0x38] sm:$0xff]  ;;  %v198_v22 = vld [vmem:[#allocation7 + $0x48] sm:$0xff]  ;;  %v199_v24 = vld [vmem:[#allocation7 + $0x50] sm:$0xff] }
  0x60   :  { %697 = vmatprep.subr.bf16.mxu1 %v953_v0  ;;  %v704_v20 = vpack.c.bf16 %v196_v19, %v195_v18  ;;  %v707_v23 = vpack.c.bf16 %v198_v22, %v197_v21  ;;  %v200_v25 = vld [vmem:[#allocation7 + $0x58] sm:$0xff]  ;;  %v201_v27 = vld [vmem:[#allocation7 + $0x60] sm:$0xff]  ;;  %v202_v28 = vld [vmem:[#allocation7 + $0x68] sm:$0xff] }
  0x61   :  { %v710_v26 = vpack.c.bf16 %v200_v25, %v199_v24  ;;  %v713_v29 = vpack.c.bf16 %v202_v28, %v201_v27  ;;  %v203_v30 = vld [vmem:[#allocation7 + $0x70] sm:$0xff]  ;;  %v204_v31 = vld [vmem:[#allocation7 + $0x78] sm:$0xff]  ;;  %v283_v33 = vld [vmem:[#allocation8] sm:$0xff] }
  0x62   :  { %693 = vmatpush3.bf16.msra.mxu0 %v692_v11  ;;  %v716_v32 = vpack.c.bf16 %v204_v31, %v203_v30  ;;  %v284_v34 = vld [vmem:[#allocation8 + $0x8] sm:$0xff]  ;;  %v285_v35 = vld [vmem:[#allocation8 + $0x10] sm:$0xff]  ;;  %v286_v37 = vld [vmem:[#allocation8 + $0x18] sm:$0xff] }
  0x63   :  { %718 = vmatprep.subr.bf16.mxu0 %v953_v0  ;;  %699 = vmatpush3.bf16.msra.mxu1 %v698_v13  ;;  %v719_v36 = vpack.c.bf16 %v284_v34, %v283_v33  ;;  %v722_v38 = vpack.c.bf16 %v286_v37, %v285_v35  ;;  %v287_v39 = vld [vmem:[#allocation8 + $0x20] sm:$0xff]  ;;  %v288_v40 = vld [vmem:[#allocation8 + $0x28] sm:$0xff]  ;;  %v289_v42 = vld [vmem:[#allocation8 + $0x30] sm:$0xff] }
  0x64   :  { %700 = vmatprep.subr.bf16.mxu1 %v953_v0  ;;  %v725_v41 = vpack.c.bf16 %v288_v40, %v287_v39  ;;  %v290_v43 = vld [vmem:[#allocation8 + $0x38] sm:$0xff]  ;;  %v291_v45 = vld [vmem:[#allocation8 + $0x40] sm:$0xff]  ;;  %v292_v46 = vld [vmem:[#allocation8 + $0x48] sm:$0xff] }
  0x65   :  { %581 = vmatmul.mubr.msk.f32.vlgmr.msra.gmra.mrb[0].mxu0 %vm114_vm1, %v102_v16  ;;  %v728_v44 = vpack.c.bf16 %v290_v43, %v289_v42  ;;  %v731_v47 = vpack.c.bf16 %v292_v46, %v291_v45  ;;  %v293_v48 = vld [vmem:[#allocation8 + $0x50] sm:$0xff]  ;;  %v294_v49 = vld [vmem:[#allocation8 + $0x58] sm:$0xff]  ;;  %v295_v51 = vld [vmem:[#allocation8 + $0x60] sm:$0xff] }
  0x66   :  { %650 = vmatprep.mubr.msk.f32.mxu0 %vm954_vm0, %v955_v1  ;;  %720 = vmatpush3.bf16.msra.mxu0 %v719_v36  ;;  %v734_v50 = vpack.c.bf16 %v294_v49, %v293_v48  ;;  %v296_v52 = vld [vmem:[#allocation8 + $0x68] sm:$0xff]  ;;  %v510_v54 = vld [vmem:[%s1159_s2] ss:$0 sm:$0xff]  ;;  %v297_v59 = vld [vmem:[#allocation8 + $0x70] sm:$0xff] }
  0x67   :  { %702 = vmatpush3.bf16.msra.mxu1 %v701_v17  ;;  %721 = vmatprep.subr.bf16.mxu0 %v953_v0  ;;  %v737_v53 = vpack.c.bf16 %v296_v52, %v295_v51  ;;  %v298_v60 = vld [vmem:[#allocation8 + $0x78] sm:$0xff]  ;;  %v377_v62 = vld [vmem:[#allocation10] sm:$0xff]  ;;  %v378_v63 = vld [vmem:[#allocation10 + $0x8] sm:$0xff] }
  0x68   :  { %703 = vmatprep.subr.bf16.mxu1 %v953_v0  ;;  %v740_v61 = vpack.c.bf16 %v298_v60, %v297_v59  ;;  %v379_v2 = vld [vmem:[#allocation10 + $0x10] sm:$0xff]  ;;  %v743_v3 = vpack.c.bf16 %v378_v63, %v377_v62  ;;  %v380_v4 = vld [vmem:[#allocation10 + $0x18] sm:$0xff]  ;;  %v381_v6 = vld [vmem:[#allocation10 + $0x20] sm:$0xff] }
  0x69   :  { %v746_v5 = vpack.c.bf16 %v380_v4, %v379_v2  ;;  %v382_v7 = vld [vmem:[#allocation10 + $0x28] sm:$0xff]  ;;  %v384_v9 = vld [vmem:[#allocation10 + $0x38] sm:$0xff]  ;;  %v385_v11 = vld [vmem:[#allocation10 + $0x40] sm:$0xff] }
  0x6a   :  { %723 = vmatpush3.bf16.msra.mxu0 %v722_v38  ;;  %v749_v8 = vpack.c.bf16 %v382_v7, %v381_v6  ;;  %v386_v12 = vld [vmem:[#allocation10 + $0x48] sm:$0xff]  ;;  %v387_v14 = vld [vmem:[#allocation10 + $0x50] sm:$0xff]  ;;  %v388_v15 = vld [vmem:[#allocation10 + $0x58] sm:$0xff] }
  0x6b   :  { %705 = vmatpush3.bf16.msra.mxu1 %v704_v20  ;;  %724 = vmatprep.subr.bf16.mxu0 %v953_v0  ;;  %v755_v13 = vpack.c.bf16 %v386_v12, %v385_v11  ;;  %v758_v16 = vpack.c.bf16 %v388_v15, %v387_v14  ;;  %v389_v17 = vld [vmem:[#allocation10 + $0x60] sm:$0xff]  ;;  %v390_v18 = vld [vmem:[#allocation10 + $0x68] sm:$0xff]  ;;  %v512_v20 = vld [vmem:[%s1161_s4] ss:$0 sm:$0xff] }
  0x6c   :  { %706 = vmatprep.subr.bf16.mxu1 %v953_v0  ;;  %v761_v19 = vpack.c.bf16 %v390_v18, %v389_v17  ;;  %v391_v25 = vld [vmem:[#allocation10 + $0x70] sm:$0xff]  ;;  %v513_v28 = vld [vmem:[%s1163_s6] ss:$0 sm:$0xff]  ;;  %s892_s6 = scalar_lea.vmem %s496_s1, 128 }
  0x6d   :  { %p893_p12 = scmp.ne.s32.totalorder %s496_s1, %s892_s6  ;;  %p898_p0 = scmp.lt.s32.totalorder %s892_s6, %s892_s6 }
  0x6e   :  { %726 = vmatpush3.bf16.msra.mxu0 %v725_v41 }
  0x6f   :  { %708 = vmatpush3.bf16.msra.mxu1 %v707_v23  ;;  %727 = vmatprep.subr.bf16.mxu0 %v953_v0  ;;  %p899_p1 = por %p898_p0, %p897_p13 }
  0x70   :  { %709 = vmatprep.subr.bf16.mxu1 %v953_v0 }
  0x71   :  { %p900_p2 = pnand %p899_p1, %p893_p12 }
  0x72   :  { %729 = vmatpush3.bf16.msra.mxu0 %v728_v44 }
  0x73   :  { %711 = vmatpush3.bf16.msra.mxu1 %v710_v26  ;;  %730 = vmatprep.subr.bf16.mxu0 %v953_v0  ;;  %v392_v26 = vld [vmem:[#allocation10 + $0x78] sm:$0xff] }
  0x74   :  { %712 = vmatprep.subr.bf16.mxu1 %v953_v0  ;;  %v764_v27 = vpack.c.bf16 %v392_v26, %v391_v25 }
  0x76   :  { %732 = vmatpush3.bf16.msra.mxu0 %v731_v47 }
  0x77   :  { %714 = vmatpush3.bf16.msra.mxu1 %v713_v29  ;;  %733 = vmatprep.subr.bf16.mxu0 %v953_v0 }
  0x78   :  { %715 = vmatprep.subr.bf16.mxu1 %v953_v0 }
  0x7a   :  { %735 = vmatpush3.bf16.msra.mxu0 %v734_v50 }
  0x7b   :  { %717 = vmatpush3.bf16.msra.mxu1 %v716_v32  ;;  %736 = vmatprep.subr.bf16.mxu0 %v953_v0  ;;  %v514_v32 = vld [vmem:[%s1165_s8] ss:$0 sm:$0xff] }
  0x7c   :  { %742 = vmatprep.subr.bf16.mxu1 %v953_v0 }
  0x7e   :  { %738 = vmatpush3.bf16.msra.mxu0 %v737_v53 }
  0x7f   :  { %739 = vmatprep.subr.bf16.mxu0 %v953_v0 }
  0x82   :  { %741 = vmatpush3.bf16.msra.mxu0 %v740_v61 }
 0x138   :  { %v184_v55 = vpop.f32.mrb[0].mxu0 }
 0x139   :  { %v185_v56 = vadd.f32 %v510_v54, %v184_v55  ;;  %v582_v57 = vpop.f32.mrb[1].mxu0 }
 0x13b   :  { %v188_v58 = vmax.f32 %v185_v56, 0.0 }
 0x13d   :  { %616 = vmatmul.mubr.f32.vlgmr.msra.gmra.mrb[0].mxu1 %v188_v58 }
 0x13e   :  { %685 = vmatprep.mubr.msk.f32.mxu1 %vm954_vm0, %v955_v1  ;;  %744 = vmatpush3.bf16.msra.mxu1 %v743_v3  ;;  %v383_v1 = vld [vmem:[#allocation10 + $0x30] sm:$0xff] }
 0x13f   :  { %745 = vmatprep.subr.bf16.mxu1 %v953_v0  ;;  %v752_v10 = vpack.c.bf16 %v384_v9, %v383_v1 }
 0x142   :  { %747 = vmatpush3.bf16.msra.mxu1 %v746_v5 }
 0x143   :  { %748 = vmatprep.subr.bf16.mxu1 %v953_v0 }
 0x146   :  { %750 = vmatpush3.bf16.msra.mxu1 %v749_v8 }
 0x147   :  { %751 = vmatprep.subr.bf16.mxu1 %v953_v0 }
 0x14a   :  { %753 = vmatpush3.bf16.msra.mxu1 %v752_v10 }
 0x14b   :  { %754 = vmatprep.subr.bf16.mxu1 %v953_v0 }
 0x14e   :  { %756 = vmatpush3.bf16.msra.mxu1 %v755_v13 }
 0x14f   :  { %757 = vmatprep.subr.bf16.mxu1 %v953_v0 }
 0x152   :  { %759 = vmatpush3.bf16.msra.mxu1 %v758_v16 }
 0x153   :  { %760 = vmatprep.subr.bf16.mxu1 %v953_v0 }
 0x156   :  { %762 = vmatpush3.bf16.msra.mxu1 %v761_v19 }
 0x157   :  { %763 = vmatprep.subr.bf16.mxu1 %v953_v0 }
 0x15a   :  { %765 = vmatpush3.bf16.msra.mxu1 %v764_v27 }
 0x210   :  { %v278_v21 = vpop.f32.mrb[0].mxu1 }
 0x211   :  { %v279_v22 = vadd.f32 %v512_v20, %v278_v21  ;;  %v617_v23 = vpop.f32.mrb[1].mxu1 }
 0x213   :  { %v282_v24 = vmax.f32 %v279_v22, 0.0 }
 0x215   :  { %651 = vmatmul.mubr.f32.vlgmr.msra.gmra.mrb[2].mxu0 %v282_v24 }
 0x2e8   :  { %v372_v29 = vpop.f32.mrb[2].mxu0 }
 0x2e9   :  { %v373_v30 = vadd.f32 %v513_v28, %v372_v29  ;;  %v652_v0 = vpop.f32.mrb[3].mxu0 }
 0x2eb   :  { %v376_v31 = vmax.f32 %v373_v30, 0.0 }
 0x2ed   :  { %686 = vmatmul.mubr.f32.vlgmr.msra.gmra.mrb[2].mxu1 %v376_v31 }
 0x3c0   :  { %v466_v33 = vpop.f32.mrb[2].mxu1 }
 0x3c1   :  { %v467_v34 = vadd.f32 %v514_v32, %v466_v33  ;;  %v687_v35 = vpop.f32.mrb[3].mxu1 }
 0x3c3   :  { %v515_v36 = vmul.f32 -1.442695, %v467_v34  ;;  %471 = vst.msk [vmem:[#allocation12] sm:$0xff] %vm470_vm2, %v467_v34 }
 0x3c4   :  { %903 = shalt.err (!%p900_p2)
}
 0x3c5   :  { %s904_s8 = scalar_lea.hbm %s1167_s10, 128 }
 0x3c6   :  { %p905_p3 = scmp.ne.s32.totalorder %s1167_s10, %s904_s8  ;;  %p908_p4 = scmp.lt.u32.totalorder %s904_s8, %s1167_s10 }
 0x3c8   :  { %p910_p5 = pnand %p908_p4, %p905_p3 }
 0x3ca   :  { %913 = shalt.err (!%p910_p5)
}
 0x3cb   :  { %498 = dma.vmem_to_hbm [thread:$0]  %s496_s1, 128, %s1167_s10, [#allocation13]   ;;  %778 = vpow2.f32 %v515_v36 }
 0x3cc   :  { %s957_s26 = smov [#allocation11]  }
 0x3cd   :  { %s485_s27 = sshll.u32 %s957_s26, 4  ;;  %s486_s27 = int_to_ptr.vmem [resolvable:$true] %s485_s27 }
 0x3ce   :  { %s914_s29 = scalar_lea.vmem %s486_s27, 128  ;;  %p919_p7 = scmp.lt.s32.totalorder %s486_s27, %s486_s27 }
 0x3cf   :  { %p915_p6 = scmp.ne.s32.totalorder %s486_s27, %s914_s29  ;;  %p920_p8 = scmp.lt.s32.totalorder %s914_s29, %s914_s29 }
 0x3d1   :  { %p921_p9 = por %p920_p8, %p919_p7 }
 0x3d3   :  { %p922_p10 = pnand %p921_p9, %p915_p6 }
 0x3d5   :  { %v779_v37 = vpop.eup %778 }
 0x3d6   :  { %v475_v38 = vadd.f32 1.0, %v779_v37 }
 0x3d8   :  { %780 = vrcp.f32 %v475_v38 }
 0x3e2   :  { %v781_v39 = vpop.eup %780 }
 0x3e3   :  { %478 = vst.msk [vmem:[#allocation11] sm:$0xff] %vm470_vm2, %v781_v39 }
 0x3e4   :  { %925 = shalt.err (!%p922_p10)
}
 0x3e5   :  { %s926_s10 = scalar_lea.hbm %s1166_s9, 128 }
 0x3e6   :  { %p927_p11 = scmp.ne.s32.totalorder %s1166_s9, %s926_s10  ;;  %p930_p12 = scmp.lt.u32.totalorder %s926_s10, %s1166_s9 }
 0x3e8   :  { %p932_p13 = pnand %p930_p12, %p927_p11 }
 0x3ea   :  { %935 = shalt.err (!%p932_p13)
}
 0x3eb   :  { %488 = dma.vmem_to_hbm [thread:$0]  %s486_s27, 128, %s1166_s9, [#allocation4]  }
 0x3ec   :  { %942 = dma.done.wait [#allocation4], 128  }
 0x3ed   :  { %943 = vsyncadd [#allocation4], 4294967168 }
 0x3ee   :  { %944 = dma.done.wait [#allocation13], 128  }
 0x3ef   :  { %945 = vsyncadd [#allocation13], 4294967168 }
 0x3f0   :  { %505 = vsyncpa [#allocation3], 1 }
 0x3f1   :  { %506 = vsyncpa [#allocation6], 1 }
 0x3f2   :  { %507 = vsyncpa [#allocation9], 1 }
 0x3f3   :  { %508 = vsyncpa [#allocation4], 1 }
 0x3f4   :  { %509 = vsyncpa [#allocation13], 1 }

</bundles_post_ra>
